<compile_context>
chip_gen: v7x
topology: tpu7x:2x2x1
jax: 0.10.0
libtpu: 0.0.40
codegen_flags: <defaults>
</compile_context>

<pallas_src>
from functools import partial

import jax
import jax.numpy as jnp
from jax.experimental import pallas as pl
from jax.experimental.pallas import tpu as pltpu

B = 8      # batch
E = 128    # embedding dim
H = 128    # LSTM hidden dim
V = 256    # vocab size

_VMEM = pl.BlockSpec(memory_space=pltpu.MemorySpace.VMEM)
_SMEM = pl.BlockSpec(memory_space=pltpu.MemorySpace.SMEM)


# ---------------------------------------------------------------------------
# Fused kernel: embedding gather + LSTM cell + output projection + loss + acc
# ---------------------------------------------------------------------------
def _fused_lm_kernel(tok_ref, t_ref, emb_ref, wcat_ref, b_ref, wout_ref,
                     bout_ref, h_ref, c_ref,
                     h_out_ref, c_out_ref, logits_ref, stats_ref):
    # ---- embedding gather via one-hot matmul (MXU; no dynamic indexing) ----
    tok = tok_ref[...]                                            # (B, 1) i32
    lane_v = jax.lax.broadcasted_iota(jnp.int32, (B, V), 1)       # (B, V)
    one_hot = jnp.where(lane_v == tok, 1.0, 0.0).astype(jnp.bfloat16)
    x = jnp.dot(one_hot, emb_ref[...],
                preferred_element_type=jnp.float32)               # (B, E) f32

    h = h_ref[...]                                                # (B, H) f32
    c = c_ref[...]                                                # (B, H) f32

    # ---- merged gate matmul: [x || h] @ [w_ih ; w_hh] (256-deep, one MXU pass)
    xh = jnp.concatenate([x, h], axis=-1).astype(jnp.bfloat16)    # (B, E+H)
    gates = (jnp.dot(xh, wcat_ref[...],
                     preferred_element_type=jnp.float32)
             + b_ref[...])                                        # (B, 4H) f32
    i = jax.nn.sigmoid(gates[:, 0 * H:1 * H])
    f = jax.nn.sigmoid(gates[:, 1 * H:2 * H])
    g = jnp.tanh(gates[:, 2 * H:3 * H])
    o = jax.nn.sigmoid(gates[:, 3 * H:4 * H])

    c_new = f * c + i * g
    h_new = o * jnp.tanh(c_new)
    h_out_ref[...] = h_new
    c_out_ref[...] = c_new

    # ---- output projection (bf16 weights, f32 accumulate) ----
    logits = (jnp.dot(h_new.astype(jnp.bfloat16), wout_ref[...],
                      preferred_element_type=jnp.float32)
              + bout_ref[...])                                    # (B, V) f32
    logits_ref[...] = logits

    # ---- cross entropy (mean) + argmax accuracy, all in f32 ----
    t = t_ref[...]                                                # (B, 1) i32
    row_max = jnp.max(logits, axis=-1, keepdims=True)             # (B, 1)
    z = logits - row_max
    lse = jnp.log(jnp.sum(jnp.exp(z), axis=-1, keepdims=True)) + row_max
    picked = jnp.sum(jnp.where(lane_v == t, logits, 0.0),
                     axis=-1, keepdims=True)                      # (B, 1)
    nll = lse - picked                                            # (B, 1)

    is_max = logits == row_max
    pred = jnp.min(jnp.where(is_max, lane_v, V), axis=-1, keepdims=True)

    stats_ref[0] = jnp.sum(nll) * (1.0 / B)                           # mean CE
    stats_ref[1] = jnp.sum((pred == t).astype(jnp.float32)) * (1.0 / B)  # acc


# ---------------------------------------------------------------------------
# ClassifierWithState.forward equivalent (label_key = -1)
#   torch returns (state, loss) and stores y / accuracy as attributes; here we
#   return ((h, c), loss, acc, logits).
# ---------------------------------------------------------------------------
@jax.jit
def classifier_forward(state, x_tokens, t_labels, kparams):
    h, c = state
    tok2 = x_tokens.reshape(B, 1).astype(jnp.int32)
    t2 = t_labels.reshape(B, 1).astype(jnp.int32)
    h_new, c_new, logits, stats = pl.pallas_call(
        _fused_lm_kernel,
        out_shape=(jax.ShapeDtypeStruct((B, H), jnp.float32),
                   jax.ShapeDtypeStruct((B, H), jnp.float32),
                   jax.ShapeDtypeStruct((B, V), jnp.float32),
                   jax.ShapeDtypeStruct((2,), jnp.float32)),
        in_specs=[_VMEM] * 9,
        out_specs=(_VMEM, _VMEM, _VMEM, _SMEM),
    )(tok2, t2, kparams["emb"], kparams["w_cat"], kparams["b"],
      kparams["w_out"], kparams["b_out"], h, c)
    return (h_new, c_new), stats[0], stats[1], logits


# ---------------------------------------------------------------------------
# Pure-JAX reference (mirrors the kernel's bf16 weight quantization)
# ---------------------------------------------------------------------------
def _reference(state, x_tokens, t_labels, params):
    rb = lambda a: a.astype(jnp.bfloat16).astype(jnp.float32)
    emb, w_ih, w_hh, w_out = (rb(params["emb"]), rb(params["w_ih"]),
                              rb(params["w_hh"]), rb(params["w_out"]))
    x = jnp.take(emb, x_tokens, axis=0)
    h, c = state
    hb = rb(h)
    gates = x @ w_ih + hb @ w_hh + params["b"]
    i = jax.nn.sigmoid(gates[:, 0 * H:1 * H])
    f = jax.nn.sigmoid(gates[:, 1 * H:2 * H])
    g = jnp.tanh(gates[:, 2 * H:3 * H])
    o = jax.nn.sigmoid(gates[:, 3 * H:4 * H])
    c_new = f * c + i * g
    h_new = o * jnp.tanh(c_new)
    logits = rb(h_new) @ w_out + params["b_out"]
    logp = jax.nn.log_softmax(logits, axis=-1)
    loss = -jnp.mean(logp[jnp.arange(B), t_labels])
    acc = jnp.mean((jnp.argmax(logits, axis=-1) == t_labels).astype(jnp.float32))
    return loss, acc, logits


if __name__ == "__main__":
    key = jax.random.PRNGKey(0)
    ks = jax.random.split(key, 8)
    scale = 0.1
    params = {
        "emb":   scale * jax.random.normal(ks[0], (V, E), jnp.float32),
        "w_ih":  scale * jax.random.normal(ks[1], (E, 4 * H), jnp.float32),
        "w_hh":  scale * jax.random.normal(ks[2], (H, 4 * H), jnp.float32),
        "b":     scale * jax.random.normal(ks[3], (1, 4 * H), jnp.float32),
        "w_out": scale * jax.random.normal(ks[4], (H, V), jnp.float32),
        "b_out": scale * jax.random.normal(ks[5], (1, V), jnp.float32),
    }
    # One-time setup: bf16 weights for the MXU, pre-concatenated gate weight.
    kparams = {
        "emb":   params["emb"].astype(jnp.bfloat16),                 # (V, E)
        "w_cat": jnp.concatenate([params["w_ih"], params["w_hh"]],
                                 axis=0).astype(jnp.bfloat16),       # (E+H, 4H)
        "b":     params["b"],                                        # (1, 4H)
        "w_out": params["w_out"].astype(jnp.bfloat16),               # (H, V)
        "b_out": params["b_out"],                                    # (1, V)
    }
    x_tokens = jax.random.randint(ks[6], (B,), 0, V, jnp.int32)
    t_labels = jax.random.randint(ks[7], (B,), 0, V, jnp.int32)
    state0 = (jnp.zeros((B, H), jnp.float32), jnp.zeros((B, H), jnp.float32))

    (h_new, c_new), loss, acc, logits = classifier_forward(
        state0, x_tokens, t_labels, kparams)
    jax.block_until_ready((h_new, c_new, loss, acc, logits))

    ref_loss, ref_acc, ref_logits = _reference(state0, x_tokens, t_labels, params)
    assert jnp.allclose(logits, ref_logits, atol=2e-3, rtol=2e-3)
    assert jnp.allclose(loss, ref_loss, atol=2e-3, rtol=2e-3)
    assert jnp.allclose(acc, ref_acc, atol=1e-6)

    print("KERNEL_OK")
</pallas_src>

<mosaic_0001>
module attributes {stable_mosaic.version = 11 : i64} {
  func.func @_fused_lm_kernel(%arg0: memref<8x1xi32, #tpu.memory_space<vmem>>, %arg1: memref<8x1xi32, #tpu.memory_space<vmem>>, %arg2: memref<256x128xbf16, #tpu.memory_space<vmem>>, %arg3: memref<256x512xbf16, #tpu.memory_space<vmem>>, %arg4: memref<1x512xf32, #tpu.memory_space<vmem>>, %arg5: memref<128x256xbf16, #tpu.memory_space<vmem>>, %arg6: memref<1x256xf32, #tpu.memory_space<vmem>>, %arg7: memref<8x128xf32, #tpu.memory_space<vmem>>, %arg8: memref<8x128xf32, #tpu.memory_space<vmem>>, %arg9: memref<8x128xf32, #tpu.memory_space<vmem>>, %arg10: memref<8x128xf32, #tpu.memory_space<vmem>>, %arg11: memref<8x256xf32, #tpu.memory_space<vmem>>, %arg12: memref<2xf32, #tpu.memory_space<smem>>) attributes {dimension_semantics = [], scalar_prefetch = 0 : i64, scratch_operands = 0 : i64, tpu.core_type = #tpu.core_type<tc>} {
    %c0 = arith.constant 0 : index
    %c0_0 = arith.constant 0 : index
    %0 = vector.load %arg0[%c0, %c0_0] : memref<8x1xi32, #tpu.memory_space<vmem>>, vector<8x1xi32>
    %1 = tpu.iota {dimensions = array<i32: 1>} : vector<8x256xi32>
    %2 = vector.broadcast %0 : vector<8x1xi32> to vector<8x256xi32>
    %3 = arith.cmpi eq, %1, %2 : vector<8x256xi32>
    %cst = arith.constant 1.000000e+00 : f32
    %cst_1 = arith.constant 0.000000e+00 : f32
    %4 = vector.broadcast %cst : f32 to vector<8x256xf32>
    %5 = vector.broadcast %cst_1 : f32 to vector<8x256xf32>
    %6 = arith.select %3, %4, %5 : vector<8x256xi1>, vector<8x256xf32>
    %7 = arith.truncf %6 : vector<8x256xf32> to vector<8x256xbf16>
    %c0_2 = arith.constant 0 : index
    %c0_3 = arith.constant 0 : index
    %8 = vector.load %arg2[%c0_2, %c0_3] : memref<256x128xbf16, #tpu.memory_space<vmem>>, vector<256x128xbf16>
    %cst_4 = arith.constant dense<0.000000e+00> : vector<8x128xf32>
    %9 = tpu.matmul %7, %8, %cst_4 {dimension_numbers = #tpu.dot_dimension_numbers<[1], [0], [0], [1], [0, 0, 1, 1], [], []>} : vector<8x256xbf16>, vector<256x128xbf16>, vector<8x128xf32> -> vector<8x128xf32>
    %c0_5 = arith.constant 0 : index
    %c0_6 = arith.constant 0 : index
    %10 = vector.load %arg7[%c0_5, %c0_6] : memref<8x128xf32, #tpu.memory_space<vmem>>, vector<8x128xf32>
    %c0_7 = arith.constant 0 : index
    %c0_8 = arith.constant 0 : index
    %11 = vector.load %arg8[%c0_7, %c0_8] : memref<8x128xf32, #tpu.memory_space<vmem>>, vector<8x128xf32>
    %12 = tpu.concatenate %9, %10 in 1 : vector<8x128xf32>, vector<8x128xf32> -> vector<8x256xf32>
    %13 = arith.truncf %12 : vector<8x256xf32> to vector<8x256xbf16>
    %c0_9 = arith.constant 0 : index
    %c0_10 = arith.constant 0 : index
    %14 = vector.load %arg3[%c0_9, %c0_10] : memref<256x512xbf16, #tpu.memory_space<vmem>>, vector<256x512xbf16>
    %cst_11 = arith.constant dense<0.000000e+00> : vector<8x512xf32>
    %15 = tpu.matmul %13, %14, %cst_11 {dimension_numbers = #tpu.dot_dimension_numbers<[1], [0], [0], [1], [0, 0, 1, 1], [], []>} : vector<8x256xbf16>, vector<256x512xbf16>, vector<8x512xf32> -> vector<8x512xf32>
    %c0_12 = arith.constant 0 : index
    %c0_13 = arith.constant 0 : index
    %16 = vector.load %arg4[%c0_12, %c0_13] : memref<1x512xf32, #tpu.memory_space<vmem>>, vector<1x512xf32>
    %17 = vector.broadcast %16 : vector<1x512xf32> to vector<8x512xf32>
    %18 = arith.addf %15, %17 : vector<8x512xf32>
    %19 = vector.extract_strided_slice %18 {offsets = [0, 0], sizes = [8, 128], strides = [1, 1]} : vector<8x512xf32> to vector<8x128xf32>
    %20 = arith.negf %19 : vector<8x128xf32>
    %21 = math.exp %20 : vector<8x128xf32>
    %cst_14 = arith.constant 1.000000e+00 : f32
    %22 = vector.broadcast %cst_14 : f32 to vector<8x128xf32>
    %23 = arith.addf %22, %21 : vector<8x128xf32>
    %24 = arith.divf %22, %23 : vector<8x128xf32>
    %25 = vector.extract_strided_slice %18 {offsets = [0, 128], sizes = [8, 128], strides = [1, 1]} : vector<8x512xf32> to vector<8x128xf32>
    %26 = arith.negf %25 : vector<8x128xf32>
    %27 = math.exp %26 : vector<8x128xf32>
    %cst_15 = arith.constant 1.000000e+00 : f32
    %28 = vector.broadcast %cst_15 : f32 to vector<8x128xf32>
    %29 = arith.addf %28, %27 : vector<8x128xf32>
    %30 = arith.divf %28, %29 : vector<8x128xf32>
    %31 = vector.extract_strided_slice %18 {offsets = [0, 256], sizes = [8, 128], strides = [1, 1]} : vector<8x512xf32> to vector<8x128xf32>
    %32 = math.tanh %31 : vector<8x128xf32>
    %33 = vector.extract_strided_slice %18 {offsets = [0, 384], sizes = [8, 128], strides = [1, 1]} : vector<8x512xf32> to vector<8x128xf32>
    %34 = arith.negf %33 : vector<8x128xf32>
    %35 = math.exp %34 : vector<8x128xf32>
    %cst_16 = arith.constant 1.000000e+00 : f32
    %36 = vector.broadcast %cst_16 : f32 to vector<8x128xf32>
    %37 = arith.addf %36, %35 : vector<8x128xf32>
    %38 = arith.divf %36, %37 : vector<8x128xf32>
    %39 = arith.mulf %30, %11 : vector<8x128xf32>
    %40 = arith.mulf %24, %32 : vector<8x128xf32>
    %41 = arith.addf %39, %40 : vector<8x128xf32>
    %42 = math.tanh %41 : vector<8x128xf32>
    %43 = arith.mulf %38, %42 : vector<8x128xf32>
    %c0_17 = arith.constant 0 : index
    %c0_18 = arith.constant 0 : index
    %44 = vector.load %arg9[%c0_17, %c0_18] : memref<8x128xf32, #tpu.memory_space<vmem>>, vector<8x128xf32>
    tpu.vector_store %arg9[%c0_17, %c0_18], %43 {strides = array<i32>} : memref<8x128xf32, #tpu.memory_space<vmem>>, vector<8x128xf32>,
    %c0_19 = arith.constant 0 : index
    %c0_20 = arith.constant 0 : index
    %45 = vector.load %arg10[%c0_19, %c0_20] : memref<8x128xf32, #tpu.memory_space<vmem>>, vector<8x128xf32>
    tpu.vector_store %arg10[%c0_19, %c0_20], %41 {strides = array<i32>} : memref<8x128xf32, #tpu.memory_space<vmem>>, vector<8x128xf32>,
    %46 = arith.truncf %43 : vector<8x128xf32> to vector<8x128xbf16>
    %c0_21 = arith.constant 0 : index
    %c0_22 = arith.constant 0 : index
    %47 = vector.load %arg5[%c0_21, %c0_22] : memref<128x256xbf16, #tpu.memory_space<vmem>>, vector<128x256xbf16>
    %cst_23 = arith.constant dense<0.000000e+00> : vector<8x256xf32>
    %48 = tpu.matmul %46, %47, %cst_23 {dimension_numbers = #tpu.dot_dimension_numbers<[1], [0], [0], [1], [0, 0, 1, 1], [], []>} : vector<8x128xbf16>, vector<128x256xbf16>, vector<8x256xf32> -> vector<8x256xf32>
    %c0_24 = arith.constant 0 : index
    %c0_25 = arith.constant 0 : index
    %49 = vector.load %arg6[%c0_24, %c0_25] : memref<1x256xf32, #tpu.memory_space<vmem>>, vector<1x256xf32>
    %50 = vector.broadcast %49 : vector<1x256xf32> to vector<8x256xf32>
    %51 = arith.addf %48, %50 : vector<8x256xf32>
    %c0_26 = arith.constant 0 : index
    %c0_27 = arith.constant 0 : index
    %52 = vector.load %arg11[%c0_26, %c0_27] : memref<8x256xf32, #tpu.memory_space<vmem>>, vector<8x256xf32>
    tpu.vector_store %arg11[%c0_26, %c0_27], %51 {strides = array<i32>} : memref<8x256xf32, #tpu.memory_space<vmem>>, vector<8x256xf32>,
    %c0_28 = arith.constant 0 : index
    %c0_29 = arith.constant 0 : index
    %53 = vector.load %arg1[%c0_28, %c0_29] : memref<8x1xi32, #tpu.memory_space<vmem>>, vector<8x1xi32>
    %cst_30 = arith.constant dense<0xFF800000> : vector<8xf32>
    %54 = vector.multi_reduction <maximumf>, %51, %cst_30 [1] : vector<8x256xf32> to vector<8xf32>
    %55 = vector.shape_cast %54 : vector<8xf32> to vector<8x1xf32>
    %56 = vector.broadcast %55 : vector<8x1xf32> to vector<8x256xf32>
    %57 = arith.subf %51, %56 : vector<8x256xf32>
    %58 = math.exp %57 : vector<8x256xf32>
    %cst_31 = arith.constant dense<0.000000e+00> : vector<8xf32>
    %59 = vector.multi_reduction <add>, %58, %cst_31 [1] : vector<8x256xf32> to vector<8xf32>
    %60 = vector.shape_cast %59 : vector<8xf32> to vector<8x1xf32>
    %61 = math.log %60 : vector<8x1xf32>
    %62 = arith.addf %61, %55 : vector<8x1xf32>
    %63 = vector.broadcast %53 : vector<8x1xi32> to vector<8x256xi32>
    %64 = arith.cmpi eq, %1, %63 : vector<8x256xi32>
    %cst_32 = arith.constant 0.000000e+00 : f32
    %65 = vector.broadcast %cst_32 : f32 to vector<8x256xf32>
    %66 = arith.select %64, %51, %65 : vector<8x256xi1>, vector<8x256xf32>
    %cst_33 = arith.constant dense<0.000000e+00> : vector<8xf32>
    %67 = vector.multi_reduction <add>, %66, %cst_33 [1] : vector<8x256xf32> to vector<8xf32>
    %68 = vector.shape_cast %67 : vector<8xf32> to vector<8x1xf32>
    %69 = arith.subf %62, %68 : vector<8x1xf32>
    %70 = vector.broadcast %55 : vector<8x1xf32> to vector<8x256xf32>
    %71 = arith.cmpf oeq, %51, %70 : vector<8x256xf32>
    %c256_i32 = arith.constant 256 : i32
    %72 = vector.broadcast %c256_i32 : i32 to vector<8x256xi32>
    %73 = arith.select %71, %1, %72 : vector<8x256xi1>, vector<8x256xi32>
    %cst_34 = arith.constant dense<2147483647> : vector<8xi32>
    %74 = vector.multi_reduction <minsi>, %73, %cst_34 [1] : vector<8x256xi32> to vector<8xi32>
    %75 = vector.shape_cast %74 : vector<8xi32> to vector<8x1xi32>
    %76 = vector.shape_cast %69 : vector<8x1xf32> to vector<1x8x1xf32>
    %cst_35 = arith.constant dense<0.000000e+00> : vector<1xf32>
    %77 = vector.multi_reduction <add>, %76, %cst_35 [1, 2] : vector<1x8x1xf32> to vector<1xf32>
    %78 = vector.shape_cast %77 : vector<1xf32> to vector<1x1x1xf32>
    %79 = vector.extract %78[0, 0, 0] : f32 from vector<1x1x1xf32>
    %cst_36 = arith.constant 1.250000e-01 : f32
    %80 = arith.mulf %79, %cst_36 : f32
    %c0_37 = arith.constant 0 : index
    %81 = memref.load %arg12[%c0_37] : memref<2xf32, #tpu.memory_space<smem>>
    memref.store %80, %arg12[%c0_37] : memref<2xf32, #tpu.memory_space<smem>>
    %82 = arith.cmpi eq, %75, %53 : vector<8x1xi32>
    %83 = arith.extui %82 : vector<8x1xi1> to vector<8x1xi32>
    %84 = arith.sitofp %83 : vector<8x1xi32> to vector<8x1xf32>
    %85 = vector.shape_cast %84 : vector<8x1xf32> to vector<1x8x1xf32>
    %cst_38 = arith.constant dense<0.000000e+00> : vector<1xf32>
    %86 = vector.multi_reduction <add>, %85, %cst_38 [1, 2] : vector<1x8x1xf32> to vector<1xf32>
    %87 = vector.shape_cast %86 : vector<1xf32> to vector<1x1x1xf32>
    %88 = vector.extract %87[0, 0, 0] : f32 from vector<1x1x1xf32>
    %cst_39 = arith.constant 1.250000e-01 : f32
    %89 = arith.mulf %88, %cst_39 : f32
    %c1 = arith.constant 1 : index
    %90 = memref.load %arg12[%c1] : memref<2xf32, #tpu.memory_space<smem>>
    memref.store %89, %arg12[%c1] : memref<2xf32, #tpu.memory_space<smem>>
    return
  }
}

</mosaic_0001>

<bundles_post_ra>
// kernel: classifier_forward.1
= control target key start
LH: loop header
LB: loop body
LE: loop exit
PB: predicated region body
PF: predicated region fallthrough
CT: control target
= control target key end

     0   :  { %18 = vsyncpa [#allocation3], 0  ;;  %s1717_s0 = inlined_call_operand.vmem [shape: s32[8,1], index: 0, kind: input, shape index: {}]   ;;  %s1718_s1 = inlined_call_operand.vmem [shape: s32[8,1], index: 1, kind: input, shape index: {}]   ;;  %s1719_s2 = inlined_call_operand.hbm [shape: bf16[256,128], index: 2, kind: input, shape index: {}]   ;;  %s1720_s3 = inlined_call_operand.hbm [shape: bf16[256,512], index: 3, kind: input, shape index: {}]   ;;  %s1721_s4 = inlined_call_operand.vmem [shape: f32[1,512], index: 4, kind: input, shape index: {}]   ;;  %s1722_s5 = inlined_call_operand.hbm [shape: bf16[128,256], index: 5, kind: input, shape index: {}]   ;;  %s1723_s6 = inlined_call_operand.vmem [shape: f32[1,256], index: 6, kind: input, shape index: {}]   ;;  %s1724_s7 = inlined_call_operand.vmem [shape: f32[8,128], index: 7, kind: input, shape index: {}]   ;;  %s1725_s8 = inlined_call_operand.vmem [shape: f32[8,128], index: 8, kind: input, shape index: {}]   ;;  %s1726_s9 = inlined_call_operand.hbm [shape: f32[8,128], index: 9, kind: output, shape index: {0}]   ;;  %s1727_s10 = inlined_call_operand.hbm [shape: f32[8,128], index: 10, kind: output, shape index: {1}]   ;;  %s1728_s11 = inlined_call_operand.hbm [shape: f32[8,256], index: 11, kind: output, shape index: {2}]   ;;  %s1729_s12 = inlined_call_operand.vmem [shape: f32[2], index: 12, kind: output, shape index: {3}]  }
   0x1   :  { %19 = vsyncpa [#allocation7], 0 }
   0x2   :  { %20 = vsyncpa [#allocation4], 0 }
   0x3   :  { %21 = vsyncpa [#allocation11], 0 }
   0x4   :  { %22 = vsyncpa [#allocation5], 0  ;;  %s1527_s21 = smov [#allocation6]   ;;  %s1373_s25 = scalar_lea.hbm %s1720_s3, 8192 }
   0x5   :  { %s44_s22 = sshll.u32 %s1527_s21, 4  ;;  %p1374_p0 = scmp.ne.s32.totalorder %s1720_s3, %s1373_s25  ;;  %s45_s22 = int_to_ptr.vmem [resolvable:$true] %s44_s22 }
   0x6   :  { %p1377_p1 = scmp.lt.u32.totalorder %s1373_s25, %s1720_s3 }
   0x8   :  { %p1379_p2 = pnand %p1377_p1, %p1374_p0 }
   0xa   :  { %1382 = shalt.err (!%p1379_p2)
}
   0xb   :  { %s1383_s30 = scalar_lea.vmem %s45_s22, 8192  ;;  %p1388_p4 = scmp.lt.s32.totalorder %s45_s22, %s45_s22 }
   0xc   :  { %p1384_p3 = scmp.ne.s32.totalorder %s45_s22, %s1383_s30  ;;  %p1389_p5 = scmp.lt.s32.totalorder %s1383_s30, %s1383_s30 }
   0xe   :  { %p1390_p6 = por %p1389_p5, %p1388_p4 }
  0x10   :  { %p1391_p7 = pnand %p1390_p6, %p1384_p3 }
  0x12   :  { %1394 = shalt.err (!%p1391_p7)
}
  0x13   :  { %s1528_s13 = smov 256   ;;  %s1529_s14 = smov 16  }
  0x14   :  { %50 = dma.hbm_to_vmem [thread:$0]  %s1720_s3, 8192, %s45_s22, [#allocation7], %s1528_s13, %s1528_s13, %s1529_s14  }
  0x15   :  { %s1530_s17 = smov [#allocation2]   ;;  %s1395_s21 = scalar_lea.hbm %s1719_s2, 2048 }
  0x16   :  { %s32_s18 = sshll.u32 %s1530_s17, 4  ;;  %p1396_p8 = scmp.ne.s32.totalorder %s1719_s2, %s1395_s21  ;;  %s33_s18 = int_to_ptr.vmem [resolvable:$true] %s32_s18 }
  0x17   :  { %p1399_p9 = scmp.lt.u32.totalorder %s1395_s21, %s1719_s2 }
  0x19   :  { %p1401_p10 = pnand %p1399_p9, %p1396_p8 }
  0x1b   :  { %1404 = shalt.err (!%p1401_p10)
}
  0x1c   :  { %s1405_s27 = scalar_lea.vmem %s33_s18, 2048  ;;  %p1410_p12 = scmp.lt.s32.totalorder %s33_s18, %s33_s18 }
  0x1d   :  { %p1406_p11 = scmp.ne.s32.totalorder %s33_s18, %s1405_s27  ;;  %p1411_p13 = scmp.lt.s32.totalorder %s1405_s27, %s1405_s27 }
  0x1f   :  { %p1412_p0 = por %p1411_p13, %p1410_p12 }
  0x21   :  { %p1413_p1 = pnand %p1412_p0, %p1406_p11 }
  0x23   :  { %1416 = shalt.err (!%p1413_p1)
}
  0x24   :  { %s1531_s3 = smov 64   ;;  %s1532_s22 = smov 4  }
  0x25   :  { %38 = dma.hbm_to_vmem [thread:$0]  %s1719_s2, 2048, %s33_s18, [#allocation3], %s1531_s3, %s1531_s3, %s1532_s22  }
  0x26   :  { %s1533_s30 = smov [#allocation8]   ;;  %s1417_s16 = scalar_lea.hbm %s1722_s5, 2048 }
  0x27   :  { %s58_s13 = sshll.u32 %s1533_s30, 4  ;;  %p1418_p2 = scmp.ne.s32.totalorder %s1722_s5, %s1417_s16  ;;  %s59_s13 = int_to_ptr.vmem [resolvable:$true] %s58_s13 }
  0x28   :  { %p1421_p3 = scmp.lt.u32.totalorder %s1417_s16, %s1722_s5 }
  0x2a   :  { %p1423_p4 = pnand %p1421_p3, %p1418_p2 }
  0x2c   :  { %1426 = shalt.err (!%p1423_p4)
}
  0x2d   :  { %s1427_s23 = scalar_lea.vmem %s59_s13, 2048  ;;  %p1432_p6 = scmp.lt.s32.totalorder %s59_s13, %s59_s13 }
  0x2e   :  { %p1428_p5 = scmp.ne.s32.totalorder %s59_s13, %s1427_s23  ;;  %p1433_p7 = scmp.lt.s32.totalorder %s1427_s23, %s1427_s23 }
  0x30   :  { %p1434_p8 = por %p1433_p7, %p1432_p6 }
  0x32   :  { %p1435_p9 = pnand %p1434_p8, %p1428_p5 }
  0x34   :  { %1438 = shalt.err (!%p1435_p9)
}
  0x35   :  { %s1534_s2 = smov 128   ;;  %s1535_s18 = smov 8  }
  0x36   :  { %64 = dma.hbm_to_vmem [thread:$0]  %s1722_s5, 2048, %s59_s13, [#allocation7], %s1534_s2, %s1534_s2, %s1535_s18  }
  0x37   :  { %1517 = dma.done.wait [#allocation3], 2048  }
  0x38   :  { %1518 = vsyncadd [#allocation3], 4294965248 }
  0x39   :  { %1519 = dma.done.wait [#allocation7], 10240  }
  0x3a   :  { %1520 = vsyncadd [#allocation7], 4294957056  ;;  %v1536_v0 = vmov 0   ;;  %v81_v1 = vld [vmem:[%s1717_s0] sm:$0xff]  ;;  %v1217_v4 = vld [vmem:[#allocation2 + $0x48] sm:$0xff]   ;;  %v82_v49 = vlaneseq  ;;  %vm979_vm11 = vcmask 7168  }
  0x3b   :  { %1213 = vset.pattern.permute.xlu0 %v1536_v0  ;;  %1214 = vset.pattern.permute.xlu1 %v1536_v0  ;;  %v1215_v2 = vld [vmem:[#allocation2 + $0x40] sm:$0xff]   ;;  %v1218_v5 = vld [vmem:[#allocation2 + $0x8] sm:$0xff]   ;;  %v1219_v6 = vld [vmem:[#allocation2 + $0x50] sm:$0xff]   ;;  %v1537_v55 = vmov 1.0|1.0   ;;  %s1540_s13 = smov [#allocation9]  }
  0x3c   :  { %86 = vperm.xlu0 %1213, %v81_v1   ;;  %v1216_v3 = vld [vmem:[#allocation2] sm:$0xff]   ;;  %1171 = vmatprep.subr.bf16.mxu0 %v1215_v2  ;;  %v1220_v7 = vld [vmem:[#allocation2 + $0x10] sm:$0xff]   ;;  %v1221_v8 = vld [vmem:[#allocation2 + $0x58] sm:$0xff]   ;;  %v1650_v50 = vand.u32 127, %v82_v49  ;;  %s1015_s14 = sshll.u32 %s1540_s13, 4  ;;  %s1016_s14 = int_to_ptr.vmem [resolvable:$true] %s1015_s14 }
  0x3d   :  { %1172 = vmatpush3.bf16.msra.mxu0 %v1216_v3  ;;  %v1222_v9 = vld [vmem:[#allocation2 + $0x18] sm:$0xff]   ;;  %v1223_v10 = vld [vmem:[#allocation2 + $0x60] sm:$0xff]   ;;  %v1225_v12 = vld [vmem:[#allocation2 + $0x68] sm:$0xff]  }
  0x3e   :  { %1173 = vmatprep.subr.bf16.mxu0 %v1217_v4  ;;  %v1224_v11 = vld [vmem:[#allocation2 + $0x20] sm:$0xff]   ;;  %v1226_v16 = vld [vmem:[#allocation2 + $0x28] sm:$0xff]   ;;  %v1227_v17 = vld [vmem:[#allocation2 + $0x70] sm:$0xff]   ;;  %v1653_v51 = vadd.s32 128, %v1650_v50 }
  0x3f   :  { %v1231_v13 = vld [vmem:[#allocation6 + $0x4] ss:$16 sps:$4 sm:$0xff]   ;;  %v1236_v14 = vld [vmem:[#allocation6] ss:$16 sps:$4 sm:$0xff]   ;;  %v1229_v21 = vld [vmem:[#allocation2 + $0x78] sm:$0xff]  }
  0x40   :  { %672 = vmatprep.subr.bf16.mxu1 %v1231_v13  ;;  %v1237_v15 = vld [vmem:[#allocation6 + $0x24] ss:$16 sps:$4 sm:$0xff]   ;;  %v1242_v18 = vld [vmem:[#allocation6 + $0x20] ss:$16 sps:$4 sm:$0xff]   ;;  %v1230_v24 = vld [vmem:[#allocation2 + $0x38] sm:$0xff]  }
  0x41   :  { %1174 = vmatpush3.bf16.msra.mxu0 %v1218_v5  ;;  %673 = vmatpush1.bf16.msra.mxu1 %v1236_v14  ;;  %v1243_v19 = vld [vmem:[#allocation6 + $0x44] ss:$16 sps:$4 sm:$0xff]   ;;  %v1248_v22 = vld [vmem:[#allocation6 + $0x40] ss:$16 sps:$4 sm:$0xff]   ;;  %v1235_v26 = vld [vmem:[#allocation6 + $0xc] ss:$16 sps:$4 sm:$0xff]  }
  0x42   :  { %1175 = vmatprep.subr.bf16.mxu0 %v1219_v6  ;;  %674 = vmatprep.subr.bf16.mxu1 %v1237_v15  ;;  %v1228_v20 = vld [vmem:[#allocation2 + $0x30] sm:$0xff]   ;;  %v1233_v53 = vld [vmem:[#allocation6 + $0x8] ss:$16 sps:$4 sm:$0xff]   ;;  %v1241_v54 = vld [vmem:[#allocation6 + $0x2c] ss:$16 sps:$4 sm:$0xff]  }
  0x43   :  { %v1249_v23 = vld [vmem:[#allocation6 + $0x64] ss:$16 sps:$4 sm:$0xff]   ;;  %v1254_v25 = vld [vmem:[#allocation6 + $0x60] ss:$16 sps:$4 sm:$0xff]   ;;  %v1239_v56 = vld [vmem:[#allocation6 + $0x28] ss:$16 sps:$4 sm:$0xff]  }
  0x44   :  { %v1255_v27 = vld [vmem:[#allocation6 + $0x84] ss:$16 sps:$4 sm:$0xff]   ;;  %v1260_v28 = vld [vmem:[#allocation6 + $0x80] ss:$16 sps:$4 sm:$0xff]   ;;  %v1247_v57 = vld [vmem:[#allocation6 + $0x4c] ss:$16 sps:$4 sm:$0xff]  }
  0x45   :  { %1176 = vmatpush3.bf16.msra.mxu0 %v1220_v7  ;;  %675 = vmatpush1.bf16.msra.mxu1 %v1242_v18  ;;  %v1261_v29 = vld [vmem:[#allocation6 + $0xa4] ss:$16 sps:$4 sm:$0xff]   ;;  %v1266_v30 = vld [vmem:[#allocation6 + $0xa0] ss:$16 sps:$4 sm:$0xff]   ;;  %v1245_v58 = vld [vmem:[#allocation6 + $0x48] ss:$16 sps:$4 sm:$0xff]  }
  0x46   :  { %1177 = vmatprep.subr.bf16.mxu0 %v1221_v8  ;;  %676 = vmatprep.subr.bf16.mxu1 %v1243_v19  ;;  %v1267_v31 = vld [vmem:[#allocation6 + $0xc4] ss:$16 sps:$4 sm:$0xff]   ;;  %v1272_v32 = vld [vmem:[#allocation6 + $0xc0] ss:$16 sps:$4 sm:$0xff]   ;;  %v1253_v59 = vld [vmem:[#allocation6 + $0x6c] ss:$16 sps:$4 sm:$0xff]  }
  0x47   :  { %v1273_v33 = vld [vmem:[#allocation6 + $0xe4] ss:$16 sps:$4 sm:$0xff]   ;;  %v1278_v34 = vld [vmem:[#allocation6 + $0xe0] ss:$16 sps:$4 sm:$0xff]   ;;  %v1251_v60 = vld [vmem:[#allocation6 + $0x68] ss:$16 sps:$4 sm:$0xff]  }
  0x48   :  { %v1279_v35 = vld [vmem:[#allocation6 + $0x104] ss:$16 sps:$4 sm:$0xff]   ;;  %v1284_v36 = vld [vmem:[#allocation6 + $0x100] ss:$16 sps:$4 sm:$0xff]   ;;  %v1259_v61 = vld [vmem:[#allocation6 + $0x8c] ss:$16 sps:$4 sm:$0xff]  }
  0x49   :  { %1178 = vmatpush3.bf16.msra.mxu0 %v1222_v9  ;;  %677 = vmatpush1.bf16.msra.mxu1 %v1248_v22  ;;  %v1285_v37 = vld [vmem:[#allocation6 + $0x124] ss:$16 sps:$4 sm:$0xff]   ;;  %v1290_v38 = vld [vmem:[#allocation6 + $0x120] ss:$16 sps:$4 sm:$0xff]   ;;  %v1257_v62 = vld [vmem:[#allocation6 + $0x88] ss:$16 sps:$4 sm:$0xff]  }
  0x4a   :  { %1179 = vmatprep.subr.bf16.mxu0 %v1223_v10  ;;  %678 = vmatprep.subr.bf16.mxu1 %v1249_v23  ;;  %v1291_v39 = vld [vmem:[#allocation6 + $0x144] ss:$16 sps:$4 sm:$0xff]   ;;  %v1296_v40 = vld [vmem:[#allocation6 + $0x140] ss:$16 sps:$4 sm:$0xff]   ;;  %v1265_v63 = vld [vmem:[#allocation6 + $0xac] ss:$16 sps:$4 sm:$0xff]  }
  0x4b   :  { %v1297_v41 = vld [vmem:[#allocation6 + $0x164] ss:$16 sps:$4 sm:$0xff]   ;;  %v1302_v42 = vld [vmem:[#allocation6 + $0x160] ss:$16 sps:$4 sm:$0xff]   ;;  %v1263_v1 = vld [vmem:[#allocation6 + $0xa8] ss:$16 sps:$4 sm:$0xff]  }
  0x4c   :  { %v1303_v43 = vld [vmem:[#allocation6 + $0x184] ss:$16 sps:$4 sm:$0xff]   ;;  %v1308_v44 = vld [vmem:[#allocation6 + $0x180] ss:$16 sps:$4 sm:$0xff]   ;;  %v1271_v2 = vld [vmem:[#allocation6 + $0xcc] ss:$16 sps:$4 sm:$0xff]  }
  0x4d   :  { %1180 = vmatpush3.bf16.msra.mxu0 %v1224_v11  ;;  %679 = vmatpush1.bf16.msra.mxu1 %v1254_v25  ;;  %v1309_v45 = vld [vmem:[#allocation6 + $0x1a4] ss:$16 sps:$4 sm:$0xff]   ;;  %v1314_v46 = vld [vmem:[#allocation6 + $0x1a0] ss:$16 sps:$4 sm:$0xff]   ;;  %v1269_v3 = vld [vmem:[#allocation6 + $0xc8] ss:$16 sps:$4 sm:$0xff]  }
  0x4e   :  { %1181 = vmatprep.subr.bf16.mxu0 %v1225_v12  ;;  %680 = vmatprep.subr.bf16.mxu1 %v1255_v27  ;;  %v1315_v47 = vld [vmem:[#allocation6 + $0x1c4] ss:$16 sps:$4 sm:$0xff]   ;;  %v1320_v48 = vld [vmem:[#allocation6 + $0x1c0] ss:$16 sps:$4 sm:$0xff]   ;;  %v1277_v4 = vld [vmem:[#allocation6 + $0xec] ss:$16 sps:$4 sm:$0xff]  }
  0x4f   :  { %v1275_v5 = vld [vmem:[#allocation6 + $0xe8] ss:$16 sps:$4 sm:$0xff]   ;;  %v1283_v6 = vld [vmem:[#allocation6 + $0x10c] ss:$16 sps:$4 sm:$0xff]   ;;  %v1326_v23 = vld [vmem:[#allocation6 + $0x1e0] ss:$16 sps:$4 sm:$0xff]  }
  0x50   :  { %v1281_v7 = vld [vmem:[#allocation6 + $0x108] ss:$16 sps:$4 sm:$0xff]   ;;  %v1289_v8 = vld [vmem:[#allocation6 + $0x12c] ss:$16 sps:$4 sm:$0xff]  }
  0x51   :  { %1182 = vmatpush3.bf16.msra.mxu0 %v1226_v16  ;;  %681 = vmatpush1.bf16.msra.mxu1 %v1260_v28  ;;  %v1287_v9 = vld [vmem:[#allocation6 + $0x128] ss:$16 sps:$4 sm:$0xff]   ;;  %v1295_v10 = vld [vmem:[#allocation6 + $0x14c] ss:$16 sps:$4 sm:$0xff]  }
  0x52   :  { %1183 = vmatprep.subr.bf16.mxu0 %v1227_v17  ;;  %682 = vmatprep.subr.bf16.mxu1 %v1261_v29  ;;  %v1293_v11 = vld [vmem:[#allocation6 + $0x148] ss:$16 sps:$4 sm:$0xff]   ;;  %v1301_v12 = vld [vmem:[#allocation6 + $0x16c] ss:$16 sps:$4 sm:$0xff]  }
  0x53   :  { %v1299_v13 = vld [vmem:[#allocation6 + $0x168] ss:$16 sps:$4 sm:$0xff]   ;;  %v1307_v14 = vld [vmem:[#allocation6 + $0x18c] ss:$16 sps:$4 sm:$0xff]  }
  0x54   :  { %v1305_v15 = vld [vmem:[#allocation6 + $0x188] ss:$16 sps:$4 sm:$0xff]   ;;  %v1313_v16 = vld [vmem:[#allocation6 + $0x1ac] ss:$16 sps:$4 sm:$0xff]  }
  0x55   :  { %1184 = vmatpush3.bf16.msra.mxu0 %v1228_v20  ;;  %683 = vmatpush1.bf16.msra.mxu1 %v1266_v30  ;;  %v1311_v17 = vld [vmem:[#allocation6 + $0x1a8] ss:$16 sps:$4 sm:$0xff]   ;;  %v1319_v18 = vld [vmem:[#allocation6 + $0x1cc] ss:$16 sps:$4 sm:$0xff]   ;;  %v1321_v20 = vld [vmem:[#allocation6 + $0x1e4] ss:$16 sps:$4 sm:$0xff]  }
  0x56   :  { %1185 = vmatprep.subr.bf16.mxu0 %v1229_v21  ;;  %684 = vmatprep.subr.bf16.mxu1 %v1267_v31  ;;  %v1317_v19 = vld [vmem:[#allocation6 + $0x1c8] ss:$16 sps:$4 sm:$0xff]   ;;  %v1325_v21 = vld [vmem:[#allocation6 + $0x1ec] ss:$16 sps:$4 sm:$0xff]  }
  0x57   :  { %v1323_v22 = vld [vmem:[#allocation6 + $0x1e8] ss:$16 sps:$4 sm:$0xff]  }
  0x59   :  { %1186 = vmatpush3.bf16.msra.mxu0 %v1230_v24  ;;  %685 = vmatpush1.bf16.msra.mxu1 %v1272_v32  ;;  %v262_v24 = vld [vmem:[%s1724_s7] sm:$0xff] }
  0x5a   :  { %713 = vmatprep.subr.bf16.mxu0 %v1235_v26  ;;  %686 = vmatprep.subr.bf16.mxu1 %v1273_v33  ;;  %v265_v25 = vpack.c.bf16 %v262_v24, %v262_v24  ;;  %v1329_v32 = vld [vmem:[#allocation8 + $0x4] ss:$8 sps:$4 sm:$0xff]   ;;  %v1327_v33 = vld [vmem:[#allocation8] ss:$8 sps:$4 sm:$0xff]  }
  0x5c   :  { %704 = vmatprep.mubr.bf16.mxu1 %v265_v25 }
  0x5d   :  { %687 = vmatpush1.bf16.msra.mxu1 %v1278_v34  ;;  %v1332_v34 = vld [vmem:[#allocation8 + $0x14] ss:$8 sps:$4 sm:$0xff]  }
  0x5e   :  { %688 = vmatprep.subr.bf16.mxu1 %v1279_v35  ;;  %v1330_v35 = vld [vmem:[#allocation8 + $0x10] ss:$8 sps:$4 sm:$0xff]  }
  0x61   :  { %689 = vmatpush1.bf16.msra.mxu1 %v1284_v36  ;;  %v1335_v36 = vld [vmem:[#allocation8 + $0x24] ss:$8 sps:$4 sm:$0xff]  }
  0x62   :  { %690 = vmatprep.subr.bf16.mxu1 %v1285_v37  ;;  %v1333_v37 = vld [vmem:[#allocation8 + $0x20] ss:$8 sps:$4 sm:$0xff]  }
  0x65   :  { %691 = vmatpush1.bf16.msra.mxu1 %v1290_v38  ;;  %v1338_v38 = vld [vmem:[#allocation8 + $0x34] ss:$8 sps:$4 sm:$0xff]  }
  0x66   :  { %692 = vmatprep.subr.bf16.mxu1 %v1291_v39  ;;  %v1336_v39 = vld [vmem:[#allocation8 + $0x30] ss:$8 sps:$4 sm:$0xff]  }
  0x69   :  { %693 = vmatpush1.bf16.msra.mxu1 %v1296_v40  ;;  %v1341_v40 = vld [vmem:[#allocation8 + $0x44] ss:$8 sps:$4 sm:$0xff]  }
  0x6a   :  { %694 = vmatprep.subr.bf16.mxu1 %v1297_v41  ;;  %v1339_v41 = vld [vmem:[#allocation8 + $0x40] ss:$8 sps:$4 sm:$0xff]  }
  0x6d   :  { %695 = vmatpush1.bf16.msra.mxu1 %v1302_v42  ;;  %v1342_v42 = vld [vmem:[#allocation8 + $0x50] ss:$8 sps:$4 sm:$0xff]  }
  0x6e   :  { %696 = vmatprep.subr.bf16.mxu1 %v1303_v43  ;;  %v1347_v43 = vld [vmem:[#allocation8 + $0x64] ss:$8 sps:$4 sm:$0xff]  }
  0x71   :  { %697 = vmatpush1.bf16.msra.mxu1 %v1308_v44  ;;  %v1345_v44 = vld [vmem:[#allocation8 + $0x60] ss:$8 sps:$4 sm:$0xff]  }
  0x72   :  { %698 = vmatprep.subr.bf16.mxu1 %v1309_v45  ;;  %v1350_v45 = vld [vmem:[#allocation8 + $0x74] ss:$8 sps:$4 sm:$0xff]  }
  0x75   :  { %699 = vmatpush1.bf16.msra.mxu1 %v1314_v46  ;;  %v1348_v46 = vld [vmem:[#allocation8 + $0x70] ss:$8 sps:$4 sm:$0xff]  }
  0x76   :  { %700 = vmatprep.subr.bf16.mxu1 %v1315_v47  ;;  %v333_v47 = vshrl.u32 %v82_v49, 7 }
  0x79   :  { %701 = vmatpush1.bf16.msra.mxu1 %v1320_v48  ;;  %v334_v48 = vsub.s32 0, %v333_v47 }
  0x7a   :  { %702 = vmatprep.subr.bf16.mxu1 %v1321_v20 }
  0x7d   :  { %703 = vmatpush1.bf16.msra.mxu1 %v1326_v23 }
  0x7e   :  { %889 = vmatprep.subr.bf16.mxu1 %v1329_v32 }
  0xbb   :  { %v87_v52 = vpop.permute.xlu0 %86 }
  0xbc   :  { %vm88_vm0 = vcmp.eq.s32.totalorder %v1650_v50, %v87_v52  ;;  %vm89_vm1 = vcmp.eq.s32.totalorder %v1653_v51, %v87_v52  ;;  %v330_v52 = vld [vmem:[%s1721_s4] sm:$0xf] }
  0xbd   :  { %vm1085_vm2 = vmpackc.low %vm88_vm0, %vm88_vm0 }
  0xbe   :  { %vm1083_vm3 = vmpackc.low %vm89_vm1, %vm89_vm1 }
  0xbf   :  { %1084 = vmatprep.mubr.msk.bf16.mxu0 %vm1083_vm3, %v1537_v55 }
  0xc0   :  { %1086 = vmatmul.mubr.msk.bf16.vlgmr.msra.gmra.mrb[0].mxu0 %vm1085_vm2, %v1537_v55 }
  0xc1   :  { %714 = vmatpush1.bf16.msra.mxu0 %v1233_v53  ;;  %745 = vmatprep.mubr.bf16.mxu0 %v265_v25  ;;  %v338_v53 = vsub.s32 1, %v333_v47 }
  0xc2   :  { %715 = vmatprep.subr.bf16.mxu0 %v1241_v54  ;;  %v335_v54 = vrot.slane %v330_v52, %v334_v48 }
  0xc3   :  { %v339_v55 = vrot.slane %v330_v52, %v338_v53 }
  0xc5   :  { %716 = vmatpush1.bf16.msra.mxu0 %v1239_v56 }
  0xc6   :  { %717 = vmatprep.subr.bf16.mxu0 %v1247_v57 }
  0xc9   :  { %718 = vmatpush1.bf16.msra.mxu0 %v1245_v58  ;;  %v346_v58 = vsub.s32 3, %v333_v47 }
  0xca   :  { %719 = vmatprep.subr.bf16.mxu0 %v1253_v59 }
  0xcd   :  { %720 = vmatpush1.bf16.msra.mxu0 %v1251_v60 }
  0xce   :  { %721 = vmatprep.subr.bf16.mxu0 %v1259_v61 }
  0xd1   :  { %722 = vmatpush1.bf16.msra.mxu0 %v1257_v62 }
  0xd2   :  { %723 = vmatprep.subr.bf16.mxu0 %v1265_v63 }
  0xd5   :  { %724 = vmatpush1.bf16.msra.mxu0 %v1263_v1 }
  0xd6   :  { %725 = vmatprep.subr.bf16.mxu0 %v1271_v2 }
  0xd9   :  { %726 = vmatpush1.bf16.msra.mxu0 %v1269_v3 }
  0xda   :  { %727 = vmatprep.subr.bf16.mxu0 %v1277_v4 }
  0xdd   :  { %728 = vmatpush1.bf16.msra.mxu0 %v1275_v5  ;;  %v347_v5 = vrot.slane %v330_v52, %v346_v58 }
  0xde   :  { %729 = vmatprep.subr.bf16.mxu0 %v1283_v6  ;;  %v342_v6 = vsub.s32 2, %v333_v47 }
  0xe1   :  { %730 = vmatpush1.bf16.msra.mxu0 %v1281_v7 }
  0xe2   :  { %731 = vmatprep.subr.bf16.mxu0 %v1289_v8  ;;  %v343_v8 = vrot.slane %v330_v52, %v342_v6 }
  0xe5   :  { %732 = vmatpush1.bf16.msra.mxu0 %v1287_v9 }
  0xe6   :  { %733 = vmatprep.subr.bf16.mxu0 %v1295_v10 }
  0xe9   :  { %734 = vmatpush1.bf16.msra.mxu0 %v1293_v11 }
  0xea   :  { %735 = vmatprep.subr.bf16.mxu0 %v1301_v12 }
  0xed   :  { %736 = vmatpush1.bf16.msra.mxu0 %v1299_v13 }
  0xee   :  { %737 = vmatprep.subr.bf16.mxu0 %v1307_v14 }
  0xf1   :  { %738 = vmatpush1.bf16.msra.mxu0 %v1305_v15 }
  0xf2   :  { %739 = vmatprep.subr.bf16.mxu0 %v1313_v16 }
  0xf5   :  { %740 = vmatpush1.bf16.msra.mxu0 %v1311_v17  ;;  %v263_v17 = vld [vmem:[%s1725_s8] sm:$0xff] }
  0xf6   :  { %741 = vmatprep.subr.bf16.mxu0 %v1319_v18 }
  0xf9   :  { %742 = vmatpush1.bf16.msra.mxu0 %v1317_v19 }
  0xfa   :  { %743 = vmatprep.subr.bf16.mxu0 %v1325_v21 }
  0xfd   :  { %744 = vmatpush1.bf16.msra.mxu0 %v1323_v22 }
 0x193   :  { %v1187_v26 = vpop.f32.mrb[0].mxu0 }
 0x194   :  { %v1188_v27 = vpop.f32.mrb[1].mxu0 }
 0x195   :  { %v1189_v28 = vadd.f32 %v1188_v27, %v1187_v26  ;;  %v1190_v29 = vpop.f32.mrb[2].mxu0 }
 0x196   :  { %v1191_v30 = vpop.f32.mrb[3].mxu0 }
 0x197   :  { %v264_v31 = vpack.c.bf16 %v1189_v28, %v1189_v28  ;;  %v797_v28 = vld [vmem:[%s1723_s6] sm:$0x3] }
 0x198   :  { %v802_v29 = vrot.slane %v797_v28, %v334_v48  ;;  %v806_v30 = vrot.slane %v797_v28, %v338_v53 }
 0x199   :  { %705 = vmatmul.mubr.bf16.vlgmr.msra.gmra.mrb[0].mxu1 %v264_v31  ;;  %746 = vmatmul.mubr.bf16.vlgmr.msra.gmra.mrb[4].mxu0 %v264_v31 }
 0x19a   :  { %921 = vmatprep.mubr.bf16.mxu1 %v1536_v0  ;;  %890 = vmatpush1.bf16.msra.mxu1 %v1327_v33  ;;  %v1344_v0 = vld [vmem:[#allocation8 + $0x54] ss:$8 sps:$4 sm:$0xff]  }
 0x19b   :  { %891 = vmatprep.subr.bf16.mxu1 %v1332_v34 }
 0x19e   :  { %892 = vmatpush1.bf16.msra.mxu1 %v1330_v35 }
 0x19f   :  { %893 = vmatprep.subr.bf16.mxu1 %v1335_v36 }
 0x1a2   :  { %894 = vmatpush1.bf16.msra.mxu1 %v1333_v37 }
 0x1a3   :  { %895 = vmatprep.subr.bf16.mxu1 %v1338_v38 }
 0x1a6   :  { %896 = vmatpush1.bf16.msra.mxu1 %v1336_v39 }
 0x1a7   :  { %897 = vmatprep.subr.bf16.mxu1 %v1341_v40 }
 0x1aa   :  { %898 = vmatpush1.bf16.msra.mxu1 %v1339_v41 }
 0x1ab   :  { %899 = vmatprep.subr.bf16.mxu1 %v1344_v0 }
 0x1ae   :  { %900 = vmatpush1.bf16.msra.mxu1 %v1342_v42 }
 0x1af   :  { %901 = vmatprep.subr.bf16.mxu1 %v1347_v43  ;;  %v932_v43 = vld [vmem:[%s1718_s1] sm:$0xff]  ;;  %s1539_s1 = smov [#allocation10]  }
 0x1b0   :  { %s1025_s30 = sshll.u32 %s1539_s1, 4  ;;  %s1026_s30 = int_to_ptr.vmem [resolvable:$true] %s1025_s30 }
 0x1b1   :  { %s1439_s15 = scalar_lea.vmem %s1026_s30, 128  ;;  %p1444_p11 = scmp.lt.s32.totalorder %s1026_s30, %s1026_s30 }
 0x1b2   :  { %902 = vmatpush1.bf16.msra.mxu1 %v1345_v44  ;;  %p1440_p10 = scmp.ne.s32.totalorder %s1026_s30, %s1439_s15  ;;  %p1445_p12 = scmp.lt.s32.totalorder %s1439_s15, %s1439_s15 }
 0x1b3   :  { %903 = vmatprep.subr.bf16.mxu1 %v1350_v45 }
 0x1b4   :  { %p1446_p13 = por %p1445_p12, %p1444_p11 }
 0x1b6   :  { %904 = vmatpush1.bf16.msra.mxu1 %v1348_v46  ;;  %p1447_p0 = pnand %p1446_p13, %p1440_p10 }
 0x26c   :  { %v706_v56 = vpop.f32.mrb[0].mxu1  ;;  %v747_v57 = vpop.f32.mrb[4].mxu0 }
 0x26d   :  { %v707_v59 = vadd.f32 %v706_v56, %v335_v54  ;;  %v708_v60 = vpop.f32.mrb[1].mxu1  ;;  %v749_v61 = vpop.f32.mrb[5].mxu0  ;;  %v748_v10 = vadd.f32 %v747_v57, %v343_v8 }
 0x26e   :  { %v709_v62 = vadd.f32 %v708_v60, %v339_v55  ;;  %v710_v63 = vpop.f32.mrb[2].mxu1  ;;  %v751_v1 = vpop.f32.mrb[6].mxu0  ;;  %v750_v7 = vadd.f32 %v749_v61, %v347_v5 }
 0x26f   :  { %v1151_v2 = vmul.f32 -1.442695, %v707_v59  ;;  %v711_v3 = vpop.f32.mrb[3].mxu1  ;;  %v752_v49 = vpop.f32.mrb[7].mxu0 }
 0x270   :  { %v1152_v4 = vmul.f32 -1.442695, %v709_v62  ;;  %v1153_v9 = vmul.f32 -1.442695, %v750_v7 }
 0x271   :  { %1351 = vpow2.f32 %v1151_v2 }
 0x272   :  { %1353 = vpow2.f32 %v1152_v4 }
 0x273   :  { %1355 = vpow2.f32 %v1153_v9 }
 0x274   :  { %1357 = vtanh.f32 %v748_v10 }
 0x27b   :  { %v1352_v11 = vpop.eup %1351 }
 0x27c   :  { %v1354_v12 = vpop.eup %1353  ;;  %v757_v13 = vadd.f32 1.0, %v1352_v11 }
 0x27d   :  { %v763_v14 = vadd.f32 1.0, %v1354_v12  ;;  %v1356_v15 = vpop.eup %1355 }
 0x27e   :  { %1359 = vrcp.f32 %v757_v13  ;;  %v1358_v16 = vpop.eup %1357  ;;  %v770_v21 = vadd.f32 1.0, %v1356_v15 }
 0x27f   :  { %1361 = vrcp.f32 %v763_v14 }
 0x280   :  { %1363 = vrcp.f32 %v770_v21 }
 0x288   :  { %v1360_v18 = vpop.eup %1359 }
 0x289   :  { %v1362_v19 = vpop.eup %1361  ;;  %v774_v20 = vmul.f32 %v1360_v18, %v1358_v16 }
 0x28a   :  { %v773_v22 = vmul.f32 %v1362_v19, %v263_v17  ;;  %v1364_v24 = vpop.eup %1363 }
 0x28c   :  { %v775_v23 = vadd.f32 %v774_v20, %v773_v22 }
 0x28e   :  { %1365 = vtanh.f32 %v775_v23  ;;  %779 = vst [vmem:[#allocation10] sm:$0xff] %v775_v23 }
 0x298   :  { %v1366_v25 = vpop.eup %1365 }
 0x299   :  { %v777_v26 = vmul.f32 %v1366_v25, %v1364_v24 }
 0x29b   :  { %v780_v27 = vpack.c.bf16 %v777_v26, %v777_v26  ;;  %778 = vst [vmem:[#allocation9] sm:$0xff] %v777_v26 }
 0x29d   :  { %922 = vmatmul.mubr.bf16.vlgmr.msra.gmra.mrb[4].mxu1 %v780_v27 }
 0x370   :  { %v923_v31 = vpop.f32.mrb[4].mxu1 }
 0x371   :  { %v924_v32 = vadd.f32 %v923_v31, %v802_v29  ;;  %v925_v33 = vpop.f32.mrb[5].mxu1 }
 0x372   :  { %v926_v34 = vadd.f32 %v925_v33, %v806_v30  ;;  %v927_v35 = vpop.f32.mrb[6].mxu1 }
 0x373   :  { %930 = vst [vmem:[#allocation12] sm:$0xff] %v924_v32  ;;  %v928_v36 = vpop.f32.mrb[7].mxu1 }
 0x374   :  { %931 = vst [vmem:[#allocation12 + $0x8] sm:$0xff] %v926_v34  ;;  %v933_v37 = vmax.f32 %v924_v32, %v926_v34 }
 0x376   :  { %934 = vmax.xlane.f32.xlu0 %v933_v37 }
 0x403   :  { %v935_v38 = vpop.xlane.xlu0 %934 }
 0x404   :  { %vm959_vm4 = vcmp.eq.f32.partialorder %v924_v32, %v935_v38  ;;  %vm960_vm5 = vcmp.eq.f32.partialorder %v926_v34, %v935_v38  ;;  %v936_v44 = vsub.f32 %v924_v32, %v935_v38  ;;  %v937_v45 = vsub.f32 %v926_v34, %v935_v38 }
 0x405   :  { %v961_v39 = vsel %vm959_vm4, %v1650_v50, 256  ;;  %v962_v40 = vsel %vm960_vm5, %v1653_v51, 256 }
 0x406   :  { %vm963_vm6 = vcmp.lt.s32.totalorder %v961_v39, %v962_v40  ;;  %v938_v46 = vmul.f32 1.442695, %v936_v44  ;;  %v940_v47 = vmul.f32 1.442695, %v937_v45 }
 0x407   :  { %v964_v41 = vsel %vm963_vm6, %v961_v39, %v962_v40 }
 0x408   :  { %v966_v0 = vshra.s32 %v964_v41, 16  ;;  %1367 = vpow2.f32 %v938_v46  ;;  %v965_v54 = vand.u32 65535, %v964_v41 }
 0x409   :  { %1369 = vpow2.f32 %v940_v47 }
 0x40a   :  { %v968_v42 = vcvt.s32.f32 %v966_v0  ;;  %v967_v56 = vcvt.s32.f32 %v965_v54 }
 0x40c   :  { %969 = vmin.xlane.f32.xlu1 %v968_v42 }
 0x412   :  { %v1368_v48 = vpop.eup %1367 }
 0x413   :  { %v1370_v52 = vpop.eup %1369 }
 0x414   :  { %v942_v53 = vadd.f32 %v1370_v52, %v1368_v48 }
 0x41d   :  { %949 = vperm.xlu1 %1214, %v932_v43  }
 0x441   :  { %943 = vadd.xlane.f32.xlu1 %v942_v53 }
 0x499   :  { %v970_v55 = vpop.xlane.xlu1 %969 }
 0x49a   :  { %vm971_vm7 = vcmp.eq.f32.partialorder %v968_v42, %v970_v55  ;;  %v976_v63 = vcvt.f32.s32 %v970_v55 }
 0x49b   :  { %v972_v57 = vsel %vm971_vm7, %v967_v56, inf }
 0x49c   :  { %973 = vmin.xlane.f32.xlu0 %v972_v57  ;;  %v977_v3 = vshll.u32 %v976_v63, 16 }
 0x49d   :  { %v950_v58 = vpop.permute.xlu1 %949 }
 0x49e   :  { %vm951_vm8 = vcmp.eq.s32.totalorder %v1650_v50, %v950_v58  ;;  %vm952_vm9 = vcmp.eq.s32.totalorder %v1653_v51, %v950_v58  ;;  %v1538_v51 = vmov 0.0  }
 0x49f   :  { %v953_v59 = vsel %vm951_vm8, %v924_v32, 0.0  ;;  %v954_v60 = vsel %vm952_vm9, %v926_v34, 0.0 }
 0x4a0   :  { %v955_v61 = vadd.f32 %v954_v60, %v953_v59 }
 0x4a2   :  { %956 = vadd.xlane.f32.xlu0 %v955_v61 }
 0x4ce   :  { %v944_v62 = vpop.xlane.xlu1 %943 }
 0x4cf   :  { %1371 = vlog2.f32 %v944_v62 }
 0x4d9   :  { %v1372_v1 = vpop.eup %1371 }
 0x4da   :  { %v946_v49 = vmul.f32 0.6931472, %v1372_v1 }
 0x4dc   :  { %v947_v6 = vadd.f32 %v946_v49, %v935_v38 }
 0x529   :  { %v974_v2 = vpop.xlane.xlu0 %973 }
 0x52a   :  { %v975_v4 = vcvt.f32.s32 %v974_v2 }
 0x52c   :  { %v978_v5 = vadd.s32 %v977_v3, %v975_v4 }
 0x52e   :  { %vm993_vm10 = vcmp.eq.s32.totalorder %v978_v5, %v932_v43 }
 0x52f   :  { %v957_v7 = vpop.xlane.xlu0 %956  ;;  %v1170_v9 = vsel %vm993_vm10, 1.0, %v1538_v51 }
 0x530   :  { %v958_v8 = vsub.f32 %v947_v6, %v957_v7  ;;  %v996_v10 = vsel %vm979_vm11, %v1170_v9, 0.0 }
 0x532   :  { %v980_v50 = vsel %vm979_vm11, %v958_v8, 0.0 }
 0x533   :  { %981 = vadd.xlane.f32.xlu0 %v980_v50 }
 0x537   :  { %997 = vadd.xlane.f32.xlu0 %v996_v10 }
 0x538   :  { %1450 = shalt.err (!%p1447_p0)
}
 0x539   :  { %s1451_s19 = scalar_lea.hbm %s1727_s10, 128 }
 0x53a   :  { %p1452_p1 = scmp.ne.s32.totalorder %s1727_s10, %s1451_s19  ;;  %p1455_p2 = scmp.lt.u32.totalorder %s1451_s19, %s1727_s10 }
 0x53c   :  { %p1457_p3 = pnand %p1455_p2, %p1452_p1 }
 0x53e   :  { %1460 = shalt.err (!%p1457_p3)
}
 0x53f   :  { %1028 = dma.vmem_to_hbm [thread:$0]  %s1026_s30, 128, %s1727_s10, [#allocation11]  }
 0x540   :  { %s1461_s25 = scalar_lea.vmem %s1016_s14, 128  ;;  %p1466_p5 = scmp.lt.s32.totalorder %s1016_s14, %s1016_s14 }
 0x541   :  { %p1462_p4 = scmp.ne.s32.totalorder %s1016_s14, %s1461_s25  ;;  %p1467_p6 = scmp.lt.s32.totalorder %s1461_s25, %s1461_s25 }
 0x543   :  { %p1468_p7 = por %p1467_p6, %p1466_p5 }
 0x545   :  { %p1469_p8 = pnand %p1468_p7, %p1462_p4 }
 0x547   :  { %1472 = shalt.err (!%p1469_p8)
}
 0x548   :  { %s1473_s0 = scalar_lea.hbm %s1726_s9, 128 }
 0x549   :  { %p1474_p9 = scmp.ne.s32.totalorder %s1726_s9, %s1473_s0  ;;  %p1477_p10 = scmp.lt.u32.totalorder %s1473_s0, %s1726_s9 }
 0x54b   :  { %p1479_p11 = pnand %p1477_p10, %p1474_p9 }
 0x54d   :  { %1482 = shalt.err (!%p1479_p11)
}
 0x54e   :  { %1018 = dma.vmem_to_hbm [thread:$0]  %s1016_s14, 128, %s1726_s9, [#allocation4]  }
 0x54f   :  { %s1541_s28 = smov [#allocation12]  }
 0x550   :  { %s1035_s29 = sshll.u32 %s1541_s28, 4  ;;  %s1036_s29 = int_to_ptr.vmem [resolvable:$true] %s1035_s29 }
 0x551   :  { %s1483_s6 = scalar_lea.vmem %s1036_s29, 256  ;;  %p1488_p13 = scmp.lt.s32.totalorder %s1036_s29, %s1036_s29 }
 0x552   :  { %p1484_p12 = scmp.ne.s32.totalorder %s1036_s29, %s1483_s6  ;;  %p1489_p0 = scmp.lt.s32.totalorder %s1483_s6, %s1483_s6 }
 0x554   :  { %p1490_p1 = por %p1489_p0, %p1488_p13 }
 0x556   :  { %p1491_p2 = pnand %p1490_p1, %p1484_p12 }
 0x558   :  { %1494 = shalt.err (!%p1491_p2)
}
 0x559   :  { %s1495_s30 = scalar_lea.hbm %s1728_s11, 256 }
 0x55a   :  { %p1496_p3 = scmp.ne.s32.totalorder %s1728_s11, %s1495_s30  ;;  %p1499_p4 = scmp.lt.u32.totalorder %s1495_s30, %s1728_s11 }
 0x55c   :  { %p1501_p5 = pnand %p1499_p4, %p1496_p3 }
 0x55e   :  { %1504 = shalt.err (!%p1501_p5)
}
 0x55f   :  { %1038 = dma.vmem_to_hbm [thread:$0]  %s1036_s29, 256, %s1728_s11, [#allocation11]  }
 0x560   :  { %s1045_s23 = sshll.u32 %s1729_s12, 4  ;;  %s1046_s23 = int_to_ptr.vmem [resolvable:$true] %s1045_s23 }
 0x561   :  { %s1505_s24 = scalar_lea.vmem %s1046_s23, 16  ;;  %p1510_p7 = scmp.lt.s32.totalorder %s1046_s23, %s1046_s23 }
 0x562   :  { %p1506_p6 = scmp.ne.s32.totalorder %s1046_s23, %s1505_s24  ;;  %p1511_p8 = scmp.lt.s32.totalorder %s1505_s24, %s1505_s24 }
 0x564   :  { %p1512_p9 = por %p1511_p8, %p1510_p7 }
 0x566   :  { %p1513_p10 = pnand %p1512_p9, %p1506_p6 }
 0x5c0   :  { %v982_v11 = vpop.xlane.xlu0 %981 }
 0x5c1   :  { %v983_v12 = vrot.slane %v982_v11, 4 }
 0x5c3   :  { %v984_v13 = vadd.f32 %v983_v12, %v982_v11 }
 0x5c4   :  { %v998_v14 = vpop.xlane.xlu0 %997 }
 0x5c5   :  { %v985_v15 = vrot.slane %v984_v13, 2  ;;  %v999_v16 = vrot.slane %v998_v14, 4 }
 0x5c7   :  { %v1000_v17 = vadd.f32 %v999_v16, %v998_v14  ;;  %v986_v18 = vadd.f32 %v985_v15, %v984_v13 }
 0x5c9   :  { %v1001_v19 = vrot.slane %v1000_v17, 2  ;;  %v987_v20 = vrot.slane %v986_v18, 1 }
 0x5cb   :  { %v1002_v21 = vadd.f32 %v1001_v19, %v1000_v17  ;;  %v988_v22 = vadd.f32 %v987_v20, %v986_v18 }
 0x5cd   :  { %1193 = vpush %v988_v22  ;;  %v1003_v23 = vrot.slane %v1002_v21, 1 }
 0x5cf   :  { %v1004_v24 = vadd.f32 %v1003_v23, %v1002_v21 }
 0x5d1   :  { %1195 = vpush %v1004_v24 }
 0x5fe   :  { %s1194_s19 = spop %1193 }
 0x5ff   :  { %s990_s20 = smul.f32 0.125, %s1194_s19 }
 0x601   :  { %992 = sst [smem:[#allocation13]] %s990_s20 }
 0x602   :  { %s1196_s2 = spop %1195 }
 0x603   :  { %s1006_s18 = smul.f32 0.125, %s1196_s2 }
 0x605   :  { %1008 = sst [smem:[#allocation13 + $0x1]] %s1006_s18 }
 0x606   :  { %1516 = shalt.err (!%p1513_p10)
}
 0x607   :  { %s1542_s25 = smov [#allocation13]  }
 0x608   :  { %1048 = dma.smem_to_vmem %s1542_s25, 16, %s1046_s23, [#allocation5]  }
 0x609   :  { %1521 = dma.done.wait [#allocation4], 128  }
 0x60a   :  { %1522 = vsyncadd [#allocation4], 4294967168 }
 0x60b   :  { %1523 = dma.done.wait [#allocation11], 384  }
 0x60c   :  { %1524 = vsyncadd [#allocation11], 4294966912 }
 0x60d   :  { %1525 = dma.done.wait [#allocation5], 16  }
 0x60e   :  { %1526 = vsyncadd [#allocation5], 4294967280 }
 0x60f   :  { %1061 = sfence }
 0x610   :  { %1062 = vsyncpa [#allocation3], 1 }
 0x611   :  { %1063 = vsyncpa [#allocation7], 1 }
 0x612   :  { %1064 = vsyncpa [#allocation4], 1 }
 0x613   :  { %1065 = vsyncpa [#allocation11], 1 }
 0x614   :  { %1066 = vsyncpa [#allocation5], 1 }

</bundles_post_ra>
